<compile_context>
chip_gen: v7x
topology: tpu7x:2x2x1
jax: 0.10.0
libtpu: 0.0.40
codegen_flags: <defaults>
</compile_context>

<pallas_src>
import functools

import jax
import jax.numpy as jnp
from jax.experimental import pallas as pl
from jax.experimental.pallas import tpu as pltpu

EPS = 1e-12          # matches l2normalize(v, eps=1e-12)
LANE = 128           # TPU lane width: output-channel dim is padded to this


# ---------------------------------------------------------------------------
# Kernel 1: power iteration + sigma + w_bar / sigma  (runs once per call)
# ---------------------------------------------------------------------------
def _power_iter_kernel(w_ref, wt_ref, u_ref, u_out_ref, v_out_ref, w_out_ref,
                       *, power_iterations):
    """w_ref: [O, CK] f32, wt_ref: [CK, O] f32 (pre-transposed in the wrapper
    so no in-kernel .T), u_ref: [1, O] f32."""
    W = w_ref[...]
    Wt = wt_ref[...]
    u = u_ref[...]
    v = wv = None
    for _ in range(power_iterations):
        # v = l2normalize(W^T u)   (row-vector form: u @ W)
        wt_u = jnp.dot(u, W, preferred_element_type=jnp.float32)   # [1, CK]
        v = wt_u / (jnp.sqrt(jnp.sum(wt_u * wt_u)) + EPS)
        # u = l2normalize(W v)     (row-vector form: v @ W^T)
        wv = jnp.dot(v, Wt, preferred_element_type=jnp.float32)    # [1, O]
        u = wv / (jnp.sqrt(jnp.sum(wv * wv)) + EPS)
    # exact sqrt + divide kept (matches l2normalize eps semantics; this whole
    # kernel is O*CK-sized so the cost is negligible)
    sigma = jnp.sum(u * wv)          # sigma = u_new . (W v_new)
    u_out_ref[...] = u
    v_out_ref[...] = v
    w_out_ref[...] = W / sigma


# ---------------------------------------------------------------------------
# Kernel 2: the conv as a tiled im2col matmul + bias
# ---------------------------------------------------------------------------
def _conv_matmul_kernel(p_ref, w_ref, b_ref, o_ref):
    """p_ref: [TILE_NP, CK] (bf16, streamed), w_ref: [CK, O_pad] (bf16,
    resident), b_ref: [1, O_pad] (f32, resident),
    o_ref: [TILE_NP, O_pad] (f32, lane-dense store)."""
    o_ref[...] = (jnp.dot(p_ref[...], w_ref[...],
                          preferred_element_type=jnp.float32)
                  + b_ref[...])


def spectral_norm_conv(x, w_bar, bias, u, v=None, *, power_iterations=1,
                       tile_np=512, compute_dtype=jnp.bfloat16):
    """SpectralNorm(Conv2d(C, O, 3, stride=1, padding=1)).forward(x).

    x:     [N, C, H, W] float32 (NCHW, PyTorch convention)
    w_bar: [O, C, kh, kw]   bias: [O]   u: [O]   v: [C*kh*kw]
    Returns (y [N, O, H, W] f32, u_new, v_new, w_normalized).
    Note: `v` is kept for API parity; with power_iterations >= 1 it is
    overwritten before use (exactly as in the PyTorch module), so it is not
    fed to the kernel (saves a pointless HBM->VMEM DMA).
    """
    del v
    assert power_iterations >= 1
    N, C, Hs, Ws = x.shape
    O, Ci, kh, kw = w_bar.shape
    assert Ci == C
    CK = C * kh * kw
    NP = N * Hs * Ws
    f32 = jnp.float32

    w2d = w_bar.reshape(O, CK).astype(f32)

    # ---- spectral norm: tiny one-shot Pallas kernel (f32) ----
    u_new, v_new, w_norm2d = pl.pallas_call(
        functools.partial(_power_iter_kernel,
                          power_iterations=power_iterations),
        out_shape=(
            jax.ShapeDtypeStruct((1, O), f32),
            jax.ShapeDtypeStruct((1, CK), f32),
            jax.ShapeDtypeStruct((O, CK), f32),
        ),
    )(w2d, w2d.T, u.reshape(1, O).astype(f32))

    # ---- layout plumbing for the conv matmul (free, wrapper-side) ----
    o_pad = ((O + LANE - 1) // LANE) * LANE
    w_t = jnp.zeros((CK, o_pad), compute_dtype).at[:, :O].set(
        w_norm2d.T.astype(compute_dtype))                 # [CK, O_pad], bf16
    b_row = jnp.zeros((1, o_pad), f32).at[:, :O].set(bias.astype(f32))

    # ---- im2col (padding=1, stride=1); column order (c, ki, kj) matches
    #      w_bar.reshape(O, C*kh*kw).  Done in compute_dtype to halve bytes.
    # TODO(synk): fuse im2col into the kernel (DMA shifted NHWC row windows,
    # 9 small accumulating matmuls) to kill the 9x patch materialization; it
    # is the dominant HBM traffic for production-size layers.
    xc = x.astype(compute_dtype)
    x_pad = jnp.pad(xc, ((0, 0), (0, 0), (1, 1), (1, 1)))
    cols = [x_pad[:, :, i:i + Hs, j:j + Ws]
            for i in range(kh) for j in range(kw)]
    patches = jnp.stack(cols, axis=2)                     # [N, C, kh*kw, H, W]
    patches = patches.reshape(N, CK, Hs, Ws)
    patches = patches.transpose(0, 2, 3, 1).reshape(NP, CK)   # [NP, CK]

    # ---- tile the NP (rows) axis ----
    tile = max(8, (int(tile_np) // 8) * 8)       # multiple of 8 sublanes
    tile = min(tile, -(-NP // 8) * 8)
    np_pad = -(-NP // tile) * tile
    if np_pad != NP:
        patches = jnp.pad(patches, ((0, np_pad - NP), (0, 0)))
    grid = (np_pad // tile,)

    out_flat = pl.pallas_call(
        _conv_matmul_kernel,
        out_shape=jax.ShapeDtypeStruct((np_pad, o_pad), f32),
        grid_spec=pltpu.PrefetchScalarGridSpec(
            num_scalar_prefetch=0,
            grid=grid,
            in_specs=[
                pl.BlockSpec((tile, CK), lambda i: (i, 0)),    # streamed rows
                pl.BlockSpec((CK, o_pad), lambda i: (0, 0)),   # resident W^T
                pl.BlockSpec((1, o_pad), lambda i: (0, 0)),    # resident bias
            ],
            out_specs=pl.BlockSpec((tile, o_pad), lambda i: (i, 0)),
        ),
        compiler_params=pltpu.CompilerParams(
            dimension_semantics=("parallel",)),  # v7x: rows over both TCs
    )(patches, w_t, b_row)

    # PyTorch parity requires NCHW output; drop this transpose if the
    # surrounding model can consume NHWC directly.
    y = out_flat[:NP, :O].reshape(N, Hs, Ws, O).transpose(0, 3, 1, 2)
    w_norm = w_norm2d.reshape(w_bar.shape)
    return y, u_new.reshape(O), v_new.reshape(CK), w_norm


if __name__ == "__main__":
    key = jax.random.PRNGKey(0)
    k_x, k_w, k_b, k_u, k_v = jax.random.split(key, 5)

    N, C, H, W = 2, 4, 16, 16
    O, kh, kw = 8, 3, 3

    x = jax.random.normal(k_x, (N, C, H, W), dtype=jnp.float32)
    w_bar = jax.random.normal(k_w, (O, C, kh, kw), dtype=jnp.float32) * 0.1
    bias = jax.random.normal(k_b, (O,), dtype=jnp.float32) * 0.1
    # u, v initialized N(0,1) then l2-normalized, as in _make_params
    u0 = jax.random.normal(k_u, (O,), dtype=jnp.float32)
    v0 = jax.random.normal(k_v, (C * kh * kw,), dtype=jnp.float32)
    u0 = u0 / (jnp.linalg.norm(u0) + EPS)
    v0 = v0 / (jnp.linalg.norm(v0) + EPS)

    y, u_new, v_new, w_norm = spectral_norm_conv(
        x, w_bar, bias, u0, v0, tile_np=128)
    jax.block_until_ready((y, u_new, v_new, w_norm))

    # --- reference: power iteration / sigma / w_norm (pure JAX, f32) ---
    w2d_r = w_bar.reshape(O, -1)
    u_r = u0
    v_r = None
    for _ in range(1):
        v_r = w2d_r.T @ u_r
        v_r = v_r / (jnp.linalg.norm(v_r) + EPS)
        wv_r = w2d_r @ v_r
        u_r = wv_r / (jnp.linalg.norm(wv_r) + EPS)
    sigma_r = u_r @ (w2d_r @ v_r)
    w_norm_r = w_bar / sigma_r

    assert jnp.allclose(u_new, u_r, rtol=1e-3, atol=1e-3), "u mismatch"
    assert jnp.allclose(v_new, v_r, rtol=1e-3, atol=1e-3), "v mismatch"
    assert jnp.allclose(w_norm, w_norm_r, rtol=1e-3, atol=1e-3), "w mismatch"

    # --- reference conv: use the same bf16-rounded operands the kernel saw
    #     (products exact in f32, so only summation order differs). ---
    xq = x.astype(jnp.bfloat16).astype(jnp.float32)
    wq = w_norm.astype(jnp.bfloat16).astype(jnp.float32)
    y_ref = jax.lax.conv_general_dilated(
        xq, wq, window_strides=(1, 1), padding=[(1, 1), (1, 1)],
        dimension_numbers=('NCHW', 'OIHW', 'NCHW')) + bias.reshape(1, O, 1, 1)
    assert jnp.allclose(y, y_ref, rtol=2e-3, atol=2e-3), "conv output mismatch"

    print("KERNEL_OK")
</pallas_src>

<mosaic_0001>
module attributes {stable_mosaic.version = 11 : i64} {
  func.func @_power_iter_kernel(%arg0: memref<8x36xf32, #tpu.memory_space<vmem>>, %arg1: memref<36x8xf32, #tpu.memory_space<vmem>>, %arg2: memref<1x8xf32, #tpu.memory_space<vmem>>, %arg3: memref<1x8xf32, #tpu.memory_space<vmem>>, %arg4: memref<1x36xf32, #tpu.memory_space<vmem>>, %arg5: memref<8x36xf32, #tpu.memory_space<vmem>>) attributes {dimension_semantics = [], scalar_prefetch = 0 : i64, scratch_operands = 0 : i64, tpu.core_type = #tpu.core_type<tc>} {
    %c0 = arith.constant 0 : index
    %c0_0 = arith.constant 0 : index
    %0 = vector.load %arg0[%c0, %c0_0] : memref<8x36xf32, #tpu.memory_space<vmem>>, vector<8x36xf32>
    %c0_1 = arith.constant 0 : index
    %c0_2 = arith.constant 0 : index
    %1 = vector.load %arg1[%c0_1, %c0_2] : memref<36x8xf32, #tpu.memory_space<vmem>>, vector<36x8xf32>
    %c0_3 = arith.constant 0 : index
    %c0_4 = arith.constant 0 : index
    %2 = vector.load %arg2[%c0_3, %c0_4] : memref<1x8xf32, #tpu.memory_space<vmem>>, vector<1x8xf32>
    %cst = arith.constant dense<0.000000e+00> : vector<1x36xf32>
    %3 = tpu.matmul %2, %0, %cst {dimension_numbers = #tpu.dot_dimension_numbers<[1], [0], [0], [1], [0, 0, 1, 1], [], []>} : vector<1x8xf32>, vector<8x36xf32>, vector<1x36xf32> -> vector<1x36xf32>
    %4 = arith.mulf %3, %3 : vector<1x36xf32>
    %5 = vector.shape_cast %4 : vector<1x36xf32> to vector<1x1x36xf32>
    %cst_5 = arith.constant dense<0.000000e+00> : vector<1xf32>
    %6 = vector.multi_reduction <add>, %5, %cst_5 [1, 2] : vector<1x1x36xf32> to vector<1xf32>
    %7 = vector.shape_cast %6 : vector<1xf32> to vector<1x1x1xf32>
    %8 = vector.extract %7[0, 0, 0] : f32 from vector<1x1x1xf32>
    %9 = math.sqrt %8 : f32
    %cst_6 = arith.constant 9.99999996E-13 : f32
    %10 = arith.addf %9, %cst_6 : f32
    %11 = vector.broadcast %10 : f32 to vector<1x36xf32>
    %12 = arith.divf %3, %11 : vector<1x36xf32>
    %cst_7 = arith.constant dense<0.000000e+00> : vector<1x8xf32>
    %13 = tpu.matmul %12, %1, %cst_7 {dimension_numbers = #tpu.dot_dimension_numbers<[1], [0], [0], [1], [0, 0, 1, 1], [], []>} : vector<1x36xf32>, vector<36x8xf32>, vector<1x8xf32> -> vector<1x8xf32>
    %14 = arith.mulf %13, %13 : vector<1x8xf32>
    %15 = vector.shape_cast %14 : vector<1x8xf32> to vector<1x1x8xf32>
    %cst_8 = arith.constant dense<0.000000e+00> : vector<1xf32>
    %16 = vector.multi_reduction <add>, %15, %cst_8 [1, 2] : vector<1x1x8xf32> to vector<1xf32>
    %17 = vector.shape_cast %16 : vector<1xf32> to vector<1x1x1xf32>
    %18 = vector.extract %17[0, 0, 0] : f32 from vector<1x1x1xf32>
    %19 = math.sqrt %18 : f32
    %cst_9 = arith.constant 9.99999996E-13 : f32
    %20 = arith.addf %19, %cst_9 : f32
    %21 = vector.broadcast %20 : f32 to vector<1x8xf32>
    %22 = arith.divf %13, %21 : vector<1x8xf32>
    %23 = arith.mulf %22, %13 : vector<1x8xf32>
    %24 = vector.shape_cast %23 : vector<1x8xf32> to vector<1x1x8xf32>
    %cst_10 = arith.constant dense<0.000000e+00> : vector<1xf32>
    %25 = vector.multi_reduction <add>, %24, %cst_10 [1, 2] : vector<1x1x8xf32> to vector<1xf32>
    %26 = vector.shape_cast %25 : vector<1xf32> to vector<1x1x1xf32>
    %27 = vector.extract %26[0, 0, 0] : f32 from vector<1x1x1xf32>
    %c0_11 = arith.constant 0 : index
    %c0_12 = arith.constant 0 : index
    %28 = vector.load %arg3[%c0_11, %c0_12] : memref<1x8xf32, #tpu.memory_space<vmem>>, vector<1x8xf32>
    tpu.vector_store %arg3[%c0_11, %c0_12], %22 {strides = array<i32>} : memref<1x8xf32, #tpu.memory_space<vmem>>, vector<1x8xf32>,
    %c0_13 = arith.constant 0 : index
    %c0_14 = arith.constant 0 : index
    %29 = vector.load %arg4[%c0_13, %c0_14] : memref<1x36xf32, #tpu.memory_space<vmem>>, vector<1x36xf32>
    tpu.vector_store %arg4[%c0_13, %c0_14], %12 {strides = array<i32>} : memref<1x36xf32, #tpu.memory_space<vmem>>, vector<1x36xf32>,
    %30 = vector.broadcast %27 : f32 to vector<8x36xf32>
    %31 = arith.divf %0, %30 : vector<8x36xf32>
    %c0_15 = arith.constant 0 : index
    %c0_16 = arith.constant 0 : index
    %32 = vector.load %arg5[%c0_15, %c0_16] : memref<8x36xf32, #tpu.memory_space<vmem>>, vector<8x36xf32>
    tpu.vector_store %arg5[%c0_15, %c0_16], %31 {strides = array<i32>} : memref<8x36xf32, #tpu.memory_space<vmem>>, vector<8x36xf32>,
    return
  }
}

</mosaic_0001>

<bundles_post_ra>
// kernel: tpu_custom_call.1
= control target key start
LH: loop header
LB: loop body
LE: loop exit
PB: predicated region body
PF: predicated region fallthrough
CT: control target
= control target key end

     0   :  { %11 = vsyncpa [#allocation3], 0  ;;  %vm26_vm0 = vcmask 64512   ;;  %v417_v2 = vmov 0.0   ;;  %vm418_vm1 = vmmov 0   ;;  %s521_s0 = inlined_call_operand.vmem [shape: f32[8,36], index: 0, kind: input, shape index: {}]   ;;  %s522_s1 = inlined_call_operand.vmem [shape: f32[36,8], index: 1, kind: input, shape index: {}]   ;;  %s523_s2 = inlined_call_operand.vmem [shape: f32[1,8], index: 2, kind: input, shape index: {}]   ;;  %s524_s3 = inlined_call_operand.hbm [shape: f32[1,8], index: 3, kind: output, shape index: {0}]   ;;  %s525_s4 = inlined_call_operand.hbm [shape: f32[1,36], index: 4, kind: output, shape index: {1}]   ;;  %s526_s5 = inlined_call_operand.hbm [shape: f32[8,36], index: 5, kind: output, shape index: {2}]  }
   0x1   :  { %v456_v0 = vld [vmem:[%s521_s0] sm:$0xff]  ;;  %297 = vmatprep.subr.mxu0 %v417_v2  ;;  %299 = vmatprep.mubr.msk.f32.mxu0 %vm418_vm1, %v417_v2 }
   0x2   :  { %v25_v1 = vld [vmem:[%s523_s2] sm:$0x1] }
   0x3   :  { %12 = vsyncpa [#allocation5], 0  ;;  %298 = vmatpush3.msra.mxu0 %v456_v0  ;;  %312 = vmatprep.mubr.msk.f32.mxu1 %vm418_vm1, %v417_v2  ;;  %vm101_vm2 = vcmask 286720   ;;  %v20_v10 = vld [vmem:[%s522_s1] sm:$0xff]  ;;  %v21_v11 = vld [vmem:[%s522_s1 + $0x8] sm:$0xff]  ;;  %v419_v14 = vmov 0.0|0.0  }
   0x4   :  { %300 = vmatmul.mubr.msk.f32.vlgmr.msra.gmra.mrb[0].mxu0 %vm26_vm0, %v25_v1  ;;  %v22_v12 = vld [vmem:[%s522_s1 + $0x10] sm:$0xff]  ;;  %315 = vmatprep.subr.bf16.mxu1 %v419_v14  ;;  %v316_v15 = vpack.c.bf16 %v21_v11, %v20_v10  ;;  %v23_v16 = vld [vmem:[%s522_s1 + $0x18] sm:$0xff]  ;;  %v24_v21 = vld [vmem:[%s522_s1 + $0x20] sm:$0xf]  ;;  %vm129_vm3 = vcmask 1043456   ;;  %vm125_vm6 = vcmask 293888  }
   0x5   :  { %v319_v18 = vpack.c.bf16 %v23_v16, %v22_v12  ;;  %vm204_vm7 = vcmask 57344   ;;  %s420_s10 = smov [#allocation4]   ;;  %s421_s12 = smov [#allocation2]  }
   0x6   :  { %317 = vmatpush3.bf16.msra.mxu1 %v316_v15  ;;  %s261_s11 = sshll.u32 %s420_s10, 4  ;;  %s251_s13 = sshll.u32 %s421_s12, 4  ;;  %s262_s11 = int_to_ptr.vmem [resolvable:$true] %s261_s11  ;;  %s252_s13 = int_to_ptr.vmem [resolvable:$true] %s251_s13 }
   0x7   :  { %318 = vmatprep.subr.bf16.mxu1 %v419_v14  ;;  %s347_s14 = scalar_lea.vmem %s262_s11, 16  ;;  %s351_s15 = scalar_lea.vmem %s262_s11, 32 }
   0x8   :  { %p348_p0 = scmp.ne.s32.totalorder %s262_s11, %s347_s14  ;;  %p352_p1 = scmp.lt.s32.totalorder %s262_s11, %s262_s11 }
   0x9   :  { %p353_p2 = scmp.lt.s32.totalorder %s351_s15, %s347_s14 }
   0xa   :  { %320 = vmatpush3.bf16.msra.mxu1 %v319_v18 }
   0xb   :  { %310 = vmatprep.subr.mxu1 %v417_v2  ;;  %p354_p3 = por %p353_p2, %p352_p1 }
   0xd   :  { %p355_p4 = pnand %p354_p3, %p348_p0 }
   0xe   :  { %311 = vmatpush3.msk.msra.mxu1 %vm129_vm3, %v24_v21 }
  0xd7   :  { %v96_v3 = vpop.f32.mrb[0].mxu0 }
  0xd8   :  { %v301_v4 = vpop.f32.mrb[1].mxu0  ;;  %v100_v5 = vmul.f32 %v96_v3, %v96_v3 }
  0xda   :  { %v102_v6 = vsel %vm101_vm2, %v100_v5, 0.0 }
  0xdb   :  { %103 = vadd.xlane.f32.xlu0 %v102_v6 }
 0x168   :  { %v104_v7 = vpop.xlane.xlu0 %103 }
 0x169   :  { %v105_v8 = vrot.slane %v104_v7, 4 }
 0x16b   :  { %v106_v9 = vadd.f32 %v105_v8, %v104_v7 }
 0x16d   :  { %v107_v13 = vrot.slane %v106_v9, 2 }
 0x16f   :  { %v108_v17 = vadd.f32 %v107_v13, %v106_v9 }
 0x171   :  { %v109_v19 = vrot.slane %v108_v17, 1 }
 0x173   :  { %v110_v20 = vadd.f32 %v109_v19, %v108_v17 }
 0x175   :  { %321 = vpush %v110_v20 }
 0x1a6   :  { %s322_s30 = spop %321 }
 0x1a7   :  { %v112_v22 = vstv %s322_s30 }
 0x1a8   :  { %337 = vrsqrt.f32 %v112_v22  ;;  %vm115_vm4 = vcmp.eq.f32.partialorder %v112_v22, inf  ;;  %v118_v25 = vand.u32 2147483648, %v112_v22  ;;  %vm117_vm5 = vcmp.eq.f32.partialorder %v112_v22, 0.0 }
 0x1b2   :  { %v338_v23 = vpop.eup %337 }
 0x1b3   :  { %v114_v24 = vmul.f32 %v338_v23, %v112_v22 }
 0x1b5   :  { %v116_v26 = vsel %vm115_vm4, %v112_v22, %v114_v24 }
 0x1b6   :  { %v119_v27 = vsel %vm117_vm5, %v118_v25, %v116_v26 }
 0x1b7   :  { %323 = vpush %v119_v27 }
 0x1e8   :  { %s324_s6 = spop %323 }
 0x1e9   :  { %s121_s7 = sadd.f32 1e-12, %s324_s6 }
 0x1eb   :  { %v122_v28 = vstv %s121_s7 }
 0x1ec   :  { %339 = vrcp.f32 %v122_v28 }
 0x1f6   :  { %v340_v29 = vpop.eup %339 }
 0x1f7   :  { %v124_v30 = vmul.f32 %v340_v29, %v96_v3 }
 0x1f9   :  { %313 = vmatmul.mubr.msk.f32.vlgmr.msra.gmra.mrb[0].mxu1 %vm125_vm6, %v124_v30  ;;  %240 = vst.msk [vmem:[#allocation4] sm:$0x1] %vm101_vm2, %v124_v30 }
 0x2cc   :  { %v199_v31 = vpop.f32.mrb[0].mxu1 }
 0x2cd   :  { %v314_v32 = vpop.f32.mrb[1].mxu1  ;;  %v203_v33 = vmul.f32 %v199_v31, %v199_v31 }
 0x2cf   :  { %v205_v34 = vsel %vm204_vm7, %v203_v33, 0.0 }
 0x2d0   :  { %206 = vadd.xlane.f32.xlu0 %v205_v34 }
 0x35d   :  { %v207_v35 = vpop.xlane.xlu0 %206 }
 0x35e   :  { %v208_v36 = vrot.slane %v207_v35, 4 }
 0x360   :  { %v209_v37 = vadd.f32 %v208_v36, %v207_v35 }
 0x362   :  { %v210_v38 = vrot.slane %v209_v37, 2 }
 0x364   :  { %v211_v39 = vadd.f32 %v210_v38, %v209_v37 }
 0x366   :  { %v212_v40 = vrot.slane %v211_v39, 1 }
 0x368   :  { %v213_v41 = vadd.f32 %v212_v40, %v211_v39 }
 0x36a   :  { %325 = vpush %v213_v41 }
 0x39b   :  { %s326_s1 = spop %325 }
 0x39c   :  { %v215_v42 = vstv %s326_s1 }
 0x39d   :  { %341 = vrsqrt.f32 %v215_v42  ;;  %vm218_vm8 = vcmp.eq.f32.partialorder %v215_v42, inf  ;;  %v221_v45 = vand.u32 2147483648, %v215_v42  ;;  %vm220_vm9 = vcmp.eq.f32.partialorder %v215_v42, 0.0 }
 0x3a7   :  { %v342_v43 = vpop.eup %341 }
 0x3a8   :  { %v217_v44 = vmul.f32 %v342_v43, %v215_v42 }
 0x3aa   :  { %v219_v46 = vsel %vm218_vm8, %v215_v42, %v217_v44 }
 0x3ab   :  { %v222_v47 = vsel %vm220_vm9, %v221_v45, %v219_v46 }
 0x3ac   :  { %327 = vpush %v222_v47 }
 0x3dd   :  { %s328_s8 = spop %327 }
 0x3de   :  { %s224_s9 = sadd.f32 1e-12, %s328_s8 }
 0x3e0   :  { %v225_v48 = vstv %s224_s9 }
 0x3e1   :  { %343 = vrcp.f32 %v225_v48 }
 0x3eb   :  { %v344_v49 = vpop.eup %343 }
 0x3ec   :  { %v227_v50 = vmul.f32 %v344_v49, %v199_v31 }
 0x3ee   :  { %v228_v51 = vmul.f32 %v227_v50, %v199_v31  ;;  %239 = vst.msk [vmem:[#allocation2] sm:$0x1] %vm204_vm7, %v227_v50 }
 0x3f0   :  { %v229_v52 = vsel %vm204_vm7, %v228_v51, 0.0 }
 0x3f1   :  { %230 = vadd.xlane.f32.xlu1 %v229_v52 }
 0x3f2   :  { %358 = shalt.err (!%p355_p4)
}
 0x3f3   :  { %s359_s18 = scalar_lea.hbm %s525_s4, 16 }
 0x3f4   :  { %p360_p5 = scmp.ne.s32.totalorder %s525_s4, %s359_s18  ;;  %p363_p6 = scmp.lt.u32.totalorder %s359_s18, %s525_s4 }
 0x3f6   :  { %p365_p7 = pnand %p363_p6, %p360_p5 }
 0x3f8   :  { %368 = shalt.err (!%p365_p7)
}
 0x3f9   :  { %264 = dma.vmem_to_hbm [thread:$0]  %s262_s11, 16, %s525_s4, [#allocation5]  }
 0x3fa   :  { %s369_s23 = scalar_lea.vmem %s252_s13, 16  ;;  %s373_s24 = scalar_lea.vmem %s252_s13, 32 }
 0x3fb   :  { %p370_p8 = scmp.ne.s32.totalorder %s252_s13, %s369_s23  ;;  %p374_p9 = scmp.lt.s32.totalorder %s252_s13, %s252_s13 }
 0x3fc   :  { %p375_p10 = scmp.lt.s32.totalorder %s373_s24, %s369_s23 }
 0x3fe   :  { %p376_p11 = por %p375_p10, %p374_p9 }
 0x400   :  { %p377_p12 = pnand %p376_p11, %p370_p8 }
 0x402   :  { %380 = shalt.err (!%p377_p12)
}
 0x403   :  { %s381_s27 = scalar_lea.hbm %s524_s3, 16 }
 0x404   :  { %p382_p13 = scmp.ne.s32.totalorder %s524_s3, %s381_s27  ;;  %p385_p0 = scmp.lt.u32.totalorder %s381_s27, %s524_s3 }
 0x406   :  { %p387_p1 = pnand %p385_p0, %p382_p13 }
 0x408   :  { %390 = shalt.err (!%p387_p1)
}
 0x409   :  { %254 = dma.vmem_to_hbm [thread:$0]  %s252_s13, 16, %s524_s3, [#allocation3]  }
 0x40a   :  { %s422_s8 = smov [#allocation6]  }
 0x40b   :  { %s271_s9 = sshll.u32 %s422_s8, 4  ;;  %s272_s9 = int_to_ptr.vmem [resolvable:$true] %s271_s9 }
 0x40c   :  { %s391_s3 = scalar_lea.vmem %s272_s9, 128  ;;  %p396_p3 = scmp.lt.s32.totalorder %s272_s9, %s272_s9 }
 0x40d   :  { %p392_p2 = scmp.ne.s32.totalorder %s272_s9, %s391_s3  ;;  %p397_p4 = scmp.lt.s32.totalorder %s391_s3, %s391_s3 }
 0x40f   :  { %p398_p5 = por %p397_p4, %p396_p3 }
 0x411   :  { %p399_p6 = pnand %p398_p5, %p392_p2 }
 0x47e   :  { %v231_v53 = vpop.xlane.xlu1 %230 }
 0x47f   :  { %v232_v54 = vrot.slane %v231_v53, 4 }
 0x481   :  { %v233_v55 = vadd.f32 %v232_v54, %v231_v53 }
 0x483   :  { %v234_v56 = vrot.slane %v233_v55, 2 }
 0x485   :  { %v235_v57 = vadd.f32 %v234_v56, %v233_v55 }
 0x487   :  { %v236_v58 = vrot.slane %v235_v57, 1 }
 0x489   :  { %v237_v59 = vadd.f32 %v236_v58, %v235_v57 }
 0x48b   :  { %329 = vpush %v237_v59 }
 0x4bc   :  { %s330_s1 = spop %329 }
 0x4bd   :  { %v241_v60 = vstv %s330_s1 }
 0x4be   :  { %345 = vrcp.f32 %v241_v60 }
 0x4c8   :  { %v346_v61 = vpop.eup %345 }
 0x4c9   :  { %v243_v62 = vmul.f32 %v346_v61, %v456_v0 }
 0x4cb   :  { %244 = vst.msk [vmem:[#allocation6] sm:$0xff] %vm125_vm6, %v243_v62 }
 0x4cc   :  { %402 = shalt.err (!%p399_p6)
}
 0x4cd   :  { %s403_s12 = scalar_lea.hbm %s526_s5, 128 }
 0x4ce   :  { %p404_p7 = scmp.ne.s32.totalorder %s526_s5, %s403_s12  ;;  %p407_p8 = scmp.lt.u32.totalorder %s403_s12, %s526_s5 }
 0x4d0   :  { %p409_p9 = pnand %p407_p8, %p404_p7 }
 0x4d2   :  { %412 = shalt.err (!%p409_p9)
}
 0x4d3   :  { %274 = dma.vmem_to_hbm [thread:$0]  %s272_s9, 128, %s526_s5, [#allocation5]  }
 0x4d4   :  { %413 = dma.done.wait [#allocation3], 16  }
 0x4d5   :  { %414 = vsyncadd [#allocation3], 4294967280 }
 0x4d6   :  { %415 = dma.done.wait [#allocation5], 144  }
 0x4d7   :  { %416 = vsyncadd [#allocation5], 4294967152 }
 0x4d8   :  { %284 = vsyncpa [#allocation3], 1 }
 0x4d9   :  { %285 = vsyncpa [#allocation5], 1 }

</bundles_post_ra>
